<compile_context>
chip_gen: v5e
topology: v5e:2x2
jax: 0.10.0
libtpu: 0.0.40
codegen_flags: <defaults>
</compile_context>

<pallas_src>
import functools

import jax
import jax.numpy as jnp
from jax.experimental import pallas as pl
from jax.experimental.pallas import tpu as pltpu

_BN_EPS = 1e-5


def _down_kernel(x_ref, mask_ref, w1_ref, g1_ref, b1_ref, w2_ref, g2_ref,
                 b2_ref, o_ref, actw_ref, im2col_ref, *, Wp):
  """x_ref: (4, Cin, M) pool phases; activations/outputs are (C, M)."""
  M = o_ref.shape[1]
  pad = (actw_ref.shape[1] - M) // 2          # lane halo = Wp + 1
  mask_v = mask_ref[...]                      # (9, M) boundary masks

  # ---- MaxPool2d(2): dense max over the 4 pre-split phases ----
  pooled = jnp.maximum(jnp.maximum(x_ref[0], x_ref[1]),
                       jnp.maximum(x_ref[2], x_ref[3]))        # (Cin, M)

  def conv_bn_relu(act, c_in, w_ref, g_ref, b_ref):
    # Stage activation into a lane-padded buffer: zero halos, interior = act.
    actw_ref[0:c_in, 0:pad] = jnp.zeros((c_in, pad), jnp.float32)
    actw_ref[0:c_in, pad:pad + M] = act
    actw_ref[0:c_in, pad + M:pad + 2 * pad + M] = jnp.zeros((c_in, pad),
                                                            jnp.float32)
    # Build im2col rows: contiguous shifted lane windows, boundary-masked.
    tap = 0
    for dy in (-1, 0, 1):
      for dx in (-1, 0, 1):
        start = pad + dy * Wp + dx            # static, in [0, 2*pad]
        shifted = actw_ref[0:c_in, start:start + M]            # (c_in, M)
        im2col_ref[tap * c_in:(tap + 1) * c_in, :] = (
            shifted * mask_v[tap:tap + 1, :])
        tap += 1
    patches = im2col_ref[0:9 * c_in, :]                        # (9*c_in, M)

    # ---- single MXU matmul: (Cout, 9*c_in) @ (9*c_in, M) ----
    acc = jnp.dot(w_ref[...], patches, preferred_element_type=jnp.float32)

    # ---- BatchNorm (batch stats, biased var) folded to scale/shift + ReLU ----
    cnt = float(M)
    s1 = jnp.sum(acc, axis=1, keepdims=True)                   # (Co, 1)
    s2 = jnp.sum(acc * acc, axis=1, keepdims=True)
    mu = s1 / cnt
    var = jnp.maximum(s2 / cnt - mu * mu, 0.0)
    scale = g_ref[...] * jax.lax.rsqrt(var + _BN_EPS)
    shift = b_ref[...] - mu * scale
    return jnp.maximum(acc * scale + shift, 0.0)

  cin = x_ref.shape[1]
  cmid = w1_ref.shape[0]
  y = conv_bn_relu(pooled, cin, w1_ref, g1_ref, b1_ref)        # (Cmid, M)
  z = conv_bn_relu(y, cmid, w2_ref, g2_ref, b2_ref)            # (Cout, M)

  o_ref[...] = z.astype(o_ref.dtype)                           # lane-dense store


def down_forward(x_nchw, w1, g1, b1, w2, g2, b2):
  """Down block forward.  x_nchw: (N, Cin, H, W) f32 -> (N, Cout, H/2, W/2)."""
  N, Cin, H, W = x_nchw.shape
  assert H % 2 == 0 and W % 2 == 0, "MaxPool2d(2) assumes even H, W"
  Hp, Wp = H // 2, W // 2
  M = N * Hp * Wp
  Cmid = w1.shape[-1]
  Cout = w2.shape[-1]
  Cmax = max(Cin, Cmid)
  pad = Wp + 1

  x = x_nchw.astype(jnp.float32)
  # One layout op: NCHW -> (pool_phase=4, Cin, M) with M = (n, yp, xp) flat.
  x_ph = x.reshape(N, Cin, Hp, 2, Wp, 2)
  x_ph = jnp.transpose(x_ph, (3, 5, 1, 0, 2, 4)).reshape(4, Cin, M)

  # Per-tap zero-padding masks over the flattened output pixels, (9, M).
  mm = jnp.arange(M, dtype=jnp.int32)
  yp = (mm // Wp) % Hp
  xp = mm % Wp
  rows = []
  for dy in (-1, 0, 1):
    for dx in (-1, 0, 1):
      rows.append((yp + dy >= 0) & (yp + dy < Hp) &
                  (xp + dx >= 0) & (xp + dx < Wp))
  taps_mask = jnp.stack(rows, axis=0).astype(jnp.float32)

  # Weights HWIO (3,3,Ci,Co) -> (Co, 9*Ci) with K-order = (ky, kx, ci).
  w1_cf = jnp.transpose(w1, (3, 0, 1, 2)).reshape(Cmid, 9 * Cin)
  w1_cf = w1_cf.astype(jnp.float32)
  w2_cf = jnp.transpose(w2, (3, 0, 1, 2)).reshape(Cout, 9 * Cmid)
  w2_cf = w2_cf.astype(jnp.float32)

  kernel = functools.partial(_down_kernel, Wp=Wp)

  out_cf = pl.pallas_call(
      kernel,
      out_shape=jax.ShapeDtypeStruct((Cout, M), jnp.float32),
      in_specs=[pl.BlockSpec(memory_space=pltpu.MemorySpace.VMEM)] * 8,
      out_specs=pl.BlockSpec(memory_space=pltpu.MemorySpace.VMEM),
      scratch_shapes=[
          # shared lane-padded activation staging buffer (both convs)
          pltpu.VMEM((Cmax, M + 2 * pad), jnp.float32),
          # shared im2col buffer (both convs)
          pltpu.VMEM((9 * Cmax, M), jnp.float32),
      ],
      compiler_params=pltpu.CompilerParams(
          vmem_limit_bytes=32 * 1024 * 1024),
  )(x_ph, taps_mask, w1_cf,
    g1.reshape(Cmid, 1).astype(jnp.float32),
    b1.reshape(Cmid, 1).astype(jnp.float32),
    w2_cf,
    g2.reshape(Cout, 1).astype(jnp.float32),
    b2.reshape(Cout, 1).astype(jnp.float32))

  out = out_cf.reshape(Cout, N, Hp, Wp)
  return jnp.transpose(out, (1, 0, 2, 3))


# ---------------- pure-JAX reference (for a sanity check) ----------------
def _conv_bn_relu_ref(x_nchw, w_hwio, gamma, beta):
  out = jax.lax.conv_general_dilated(
      x_nchw, w_hwio, window_strides=(1, 1), padding='SAME',
      dimension_numbers=('NCHW', 'HWIO', 'NCHW'),
      precision=jax.lax.Precision.HIGHEST)
  mu = out.mean(axis=(0, 2, 3), keepdims=True)
  var = ((out - mu) ** 2).mean(axis=(0, 2, 3), keepdims=True)
  out = (out - mu) * jax.lax.rsqrt(var + _BN_EPS)
  out = out * gamma.reshape(1, -1, 1, 1) + beta.reshape(1, -1, 1, 1)
  return jnp.maximum(out, 0.0)


def down_reference(x_nchw, w1, g1, b1, w2, g2, b2):
  N, C, H, W = x_nchw.shape
  xp = x_nchw.reshape(N, C, H // 2, 2, W // 2, 2).max(axis=(3, 5))
  y = _conv_bn_relu_ref(xp, w1, g1, b1)
  return _conv_bn_relu_ref(y, w2, g2, b2)


if __name__ == "__main__":
  # Small synthetic config: Down(in_channels=4, out_channels=8)
  N, Cin, H, W = 2, 4, 16, 16
  Cout = 8
  Cmid = Cout  # DoubleConv default: mid_channels = out_channels

  key = jax.random.PRNGKey(0)
  kx, kw1, kw2, kg1, kb1, kg2, kb2 = jax.random.split(key, 7)

  x = jax.random.normal(kx, (N, Cin, H, W), jnp.float32)
  # Conv weights in HWIO (a PyTorch OIHW checkpoint would be transposed (2,3,1,0)).
  w1 = 0.2 * jax.random.normal(kw1, (3, 3, Cin, Cmid), jnp.float32)
  w2 = 0.2 * jax.random.normal(kw2, (3, 3, Cmid, Cout), jnp.float32)
  # BatchNorm affine params (randomized to exercise the affine path).
  g1 = 1.0 + 0.1 * jax.random.normal(kg1, (Cmid,), jnp.float32)
  b1 = 0.1 * jax.random.normal(kb1, (Cmid,), jnp.float32)
  g2 = 1.0 + 0.1 * jax.random.normal(kg2, (Cout,), jnp.float32)
  b2 = 0.1 * jax.random.normal(kb2, (Cout,), jnp.float32)

  out = jax.block_until_ready(down_forward(x, w1, g1, b1, w2, g2, b2))
  ref = jax.block_until_ready(down_reference(x, w1, g1, b1, w2, g2, b2))

  assert out.shape == (N, Cout, H // 2, W // 2), out.shape
  assert jnp.allclose(out, ref, atol=2e-3, rtol=2e-3), (
      float(jnp.max(jnp.abs(out - ref))))

  print("KERNEL_OK")
</pallas_src>

<mosaic_0001>
module attributes {stable_mosaic.version = 11 : i64} {
  func.func @_down_kernel(%arg0: memref<4x4x128xf32, #tpu.memory_space<vmem>>, %arg1: memref<9x128xf32, #tpu.memory_space<vmem>>, %arg2: memref<8x36xf32, #tpu.memory_space<vmem>>, %arg3: memref<8x1xf32, #tpu.memory_space<vmem>>, %arg4: memref<8x1xf32, #tpu.memory_space<vmem>>, %arg5: memref<8x72xf32, #tpu.memory_space<vmem>>, %arg6: memref<8x1xf32, #tpu.memory_space<vmem>>, %arg7: memref<8x1xf32, #tpu.memory_space<vmem>>, %arg8: memref<8x128xf32, #tpu.memory_space<vmem>>, %arg9: memref<8x146xf32, #tpu.memory_space<vmem>>, %arg10: memref<72x128xf32, #tpu.memory_space<vmem>>) attributes {dimension_semantics = [], scalar_prefetch = 0 : i64, scratch_operands = 2 : i64, tpu.core_type = #tpu.core_type<tc>} {
    %c0 = arith.constant 0 : index
    %c0_0 = arith.constant 0 : index
    %0 = vector.load %arg1[%c0, %c0_0] : memref<9x128xf32, #tpu.memory_space<vmem>>, vector<9x128xf32>
    %c0_1 = arith.constant 0 : index
    %c0_2 = arith.constant 0 : index
    %c0_3 = arith.constant 0 : index
    %1 = vector.load %arg0[%c0_1, %c0_2, %c0_3] : memref<4x4x128xf32, #tpu.memory_space<vmem>>, vector<1x4x128xf32>
    %2 = vector.shape_cast %1 : vector<1x4x128xf32> to vector<4x128xf32>
    %c1 = arith.constant 1 : index
    %c0_4 = arith.constant 0 : index
    %c0_5 = arith.constant 0 : index
    %3 = vector.load %arg0[%c1, %c0_4, %c0_5] : memref<4x4x128xf32, #tpu.memory_space<vmem>>, vector<1x4x128xf32>
    %4 = vector.shape_cast %3 : vector<1x4x128xf32> to vector<4x128xf32>
    %5 = arith.maximumf %2, %4 : vector<4x128xf32>
    %c2 = arith.constant 2 : index
    %c0_6 = arith.constant 0 : index
    %c0_7 = arith.constant 0 : index
    %6 = vector.load %arg0[%c2, %c0_6, %c0_7] : memref<4x4x128xf32, #tpu.memory_space<vmem>>, vector<1x4x128xf32>
    %7 = vector.shape_cast %6 : vector<1x4x128xf32> to vector<4x128xf32>
    %c3 = arith.constant 3 : index
    %c0_8 = arith.constant 0 : index
    %c0_9 = arith.constant 0 : index
    %8 = vector.load %arg0[%c3, %c0_8, %c0_9] : memref<4x4x128xf32, #tpu.memory_space<vmem>>, vector<1x4x128xf32>
    %9 = vector.shape_cast %8 : vector<1x4x128xf32> to vector<4x128xf32>
    %10 = arith.maximumf %7, %9 : vector<4x128xf32>
    %11 = arith.maximumf %5, %10 : vector<4x128xf32>
    %cst = arith.constant 0.000000e+00 : f32
    %12 = vector.broadcast %cst : f32 to vector<4x9xf32>
    %c0_10 = arith.constant 0 : index
    %c0_11 = arith.constant 0 : index
    %13 = vector.load %arg9[%c0_10, %c0_11] : memref<8x146xf32, #tpu.memory_space<vmem>>, vector<4x9xf32>
    tpu.vector_store %arg9[%c0_10, %c0_11], %12 {strides = array<i32>} : memref<8x146xf32, #tpu.memory_space<vmem>>, vector<4x9xf32>,
    %c0_12 = arith.constant 0 : index
    %c9 = arith.constant 9 : index
    %14 = vector.load %arg9[%c0_12, %c9] : memref<8x146xf32, #tpu.memory_space<vmem>>, vector<4x128xf32>
    tpu.vector_store %arg9[%c0_12, %c9], %11 {strides = array<i32>} : memref<8x146xf32, #tpu.memory_space<vmem>>, vector<4x128xf32>,
    %cst_13 = arith.constant 0.000000e+00 : f32
    %15 = vector.broadcast %cst_13 : f32 to vector<4x9xf32>
    %c0_14 = arith.constant 0 : index
    %c137 = arith.constant 137 : index
    %16 = vector.load %arg9[%c0_14, %c137] : memref<8x146xf32, #tpu.memory_space<vmem>>, vector<4x9xf32>
    tpu.vector_store %arg9[%c0_14, %c137], %15 {strides = array<i32>} : memref<8x146xf32, #tpu.memory_space<vmem>>, vector<4x9xf32>,
    %c0_15 = arith.constant 0 : index
    %c0_16 = arith.constant 0 : index
    %17 = vector.load %arg9[%c0_15, %c0_16] : memref<8x146xf32, #tpu.memory_space<vmem>>, vector<4x128xf32>
    %18 = vector.extract_strided_slice %0 {offsets = [0, 0], sizes = [1, 128], strides = [1, 1]} : vector<9x128xf32> to vector<1x128xf32>
    %19 = vector.broadcast %18 : vector<1x128xf32> to vector<4x128xf32>
    %20 = arith.mulf %17, %19 : vector<4x128xf32>
    %c0_17 = arith.constant 0 : index
    %c0_18 = arith.constant 0 : index
    %21 = vector.load %arg10[%c0_17, %c0_18] : memref<72x128xf32, #tpu.memory_space<vmem>>, vector<4x128xf32>
    tpu.vector_store %arg10[%c0_17, %c0_18], %20 {strides = array<i32>} : memref<72x128xf32, #tpu.memory_space<vmem>>, vector<4x128xf32>,
    %c0_19 = arith.constant 0 : index
    %c1_20 = arith.constant 1 : index
    %22 = vector.load %arg9[%c0_19, %c1_20] : memref<8x146xf32, #tpu.memory_space<vmem>>, vector<4x128xf32>
    %23 = vector.extract_strided_slice %0 {offsets = [1, 0], sizes = [1, 128], strides = [1, 1]} : vector<9x128xf32> to vector<1x128xf32>
    %24 = vector.broadcast %23 : vector<1x128xf32> to vector<4x128xf32>
    %25 = arith.mulf %22, %24 : vector<4x128xf32>
    %c4 = arith.constant 4 : index
    %c0_21 = arith.constant 0 : index
    %26 = vector.load %arg10[%c4, %c0_21] : memref<72x128xf32, #tpu.memory_space<vmem>>, vector<4x128xf32>
    tpu.vector_store %arg10[%c4, %c0_21], %25 {strides = array<i32>} : memref<72x128xf32, #tpu.memory_space<vmem>>, vector<4x128xf32>,
    %c0_22 = arith.constant 0 : index
    %c2_23 = arith.constant 2 : index
    %27 = vector.load %arg9[%c0_22, %c2_23] : memref<8x146xf32, #tpu.memory_space<vmem>>, vector<4x128xf32>
    %28 = vector.extract_strided_slice %0 {offsets = [2, 0], sizes = [1, 128], strides = [1, 1]} : vector<9x128xf32> to vector<1x128xf32>
    %29 = vector.broadcast %28 : vector<1x128xf32> to vector<4x128xf32>
    %30 = arith.mulf %27, %29 : vector<4x128xf32>
    %c8 = arith.constant 8 : index
    %c0_24 = arith.constant 0 : index
    %31 = vector.load %arg10[%c8, %c0_24] : memref<72x128xf32, #tpu.memory_space<vmem>>, vector<4x128xf32>
    tpu.vector_store %arg10[%c8, %c0_24], %30 {strides = array<i32>} : memref<72x128xf32, #tpu.memory_space<vmem>>, vector<4x128xf32>,
    %c0_25 = arith.constant 0 : index
    %c8_26 = arith.constant 8 : index
    %32 = vector.load %arg9[%c0_25, %c8_26] : memref<8x146xf32, #tpu.memory_space<vmem>>, vector<4x128xf32>
    %33 = vector.extract_strided_slice %0 {offsets = [3, 0], sizes = [1, 128], strides = [1, 1]} : vector<9x128xf32> to vector<1x128xf32>
    %34 = vector.broadcast %33 : vector<1x128xf32> to vector<4x128xf32>
    %35 = arith.mulf %32, %34 : vector<4x128xf32>
    %c12 = arith.constant 12 : index
    %c0_27 = arith.constant 0 : index
    %36 = vector.load %arg10[%c12, %c0_27] : memref<72x128xf32, #tpu.memory_space<vmem>>, vector<4x128xf32>
    tpu.vector_store %arg10[%c12, %c0_27], %35 {strides = array<i32>} : memref<72x128xf32, #tpu.memory_space<vmem>>, vector<4x128xf32>,
    %c0_28 = arith.constant 0 : index
    %c9_29 = arith.constant 9 : index
    %37 = vector.load %arg9[%c0_28, %c9_29] : memref<8x146xf32, #tpu.memory_space<vmem>>, vector<4x128xf32>
    %38 = vector.extract_strided_slice %0 {offsets = [4, 0], sizes = [1, 128], strides = [1, 1]} : vector<9x128xf32> to vector<1x128xf32>
    %39 = vector.broadcast %38 : vector<1x128xf32> to vector<4x128xf32>
    %40 = arith.mulf %37, %39 : vector<4x128xf32>
    %c16 = arith.constant 16 : index
    %c0_30 = arith.constant 0 : index
    %41 = vector.load %arg10[%c16, %c0_30] : memref<72x128xf32, #tpu.memory_space<vmem>>, vector<4x128xf32>
    tpu.vector_store %arg10[%c16, %c0_30], %40 {strides = array<i32>} : memref<72x128xf32, #tpu.memory_space<vmem>>, vector<4x128xf32>,
    %c0_31 = arith.constant 0 : index
    %c10 = arith.constant 10 : index
    %42 = vector.load %arg9[%c0_31, %c10] : memref<8x146xf32, #tpu.memory_space<vmem>>, vector<4x128xf32>
    %43 = vector.extract_strided_slice %0 {offsets = [5, 0], sizes = [1, 128], strides = [1, 1]} : vector<9x128xf32> to vector<1x128xf32>
    %44 = vector.broadcast %43 : vector<1x128xf32> to vector<4x128xf32>
    %45 = arith.mulf %42, %44 : vector<4x128xf32>
    %c20 = arith.constant 20 : index
    %c0_32 = arith.constant 0 : index
    %46 = vector.load %arg10[%c20, %c0_32] : memref<72x128xf32, #tpu.memory_space<vmem>>, vector<4x128xf32>
    tpu.vector_store %arg10[%c20, %c0_32], %45 {strides = array<i32>} : memref<72x128xf32, #tpu.memory_space<vmem>>, vector<4x128xf32>,
    %c0_33 = arith.constant 0 : index
    %c16_34 = arith.constant 16 : index
    %47 = vector.load %arg9[%c0_33, %c16_34] : memref<8x146xf32, #tpu.memory_space<vmem>>, vector<4x128xf32>
    %48 = vector.extract_strided_slice %0 {offsets = [6, 0], sizes = [1, 128], strides = [1, 1]} : vector<9x128xf32> to vector<1x128xf32>
    %49 = vector.broadcast %48 : vector<1x128xf32> to vector<4x128xf32>
    %50 = arith.mulf %47, %49 : vector<4x128xf32>
    %c24 = arith.constant 24 : index
    %c0_35 = arith.constant 0 : index
    %51 = vector.load %arg10[%c24, %c0_35] : memref<72x128xf32, #tpu.memory_space<vmem>>, vector<4x128xf32>
    tpu.vector_store %arg10[%c24, %c0_35], %50 {strides = array<i32>} : memref<72x128xf32, #tpu.memory_space<vmem>>, vector<4x128xf32>,
    %c0_36 = arith.constant 0 : index
    %c17 = arith.constant 17 : index
    %52 = vector.load %arg9[%c0_36, %c17] : memref<8x146xf32, #tpu.memory_space<vmem>>, vector<4x128xf32>
    %53 = vector.extract_strided_slice %0 {offsets = [7, 0], sizes = [1, 128], strides = [1, 1]} : vector<9x128xf32> to vector<1x128xf32>
    %54 = vector.broadcast %53 : vector<1x128xf32> to vector<4x128xf32>
    %55 = arith.mulf %52, %54 : vector<4x128xf32>
    %c28 = arith.constant 28 : index
    %c0_37 = arith.constant 0 : index
    %56 = vector.load %arg10[%c28, %c0_37] : memref<72x128xf32, #tpu.memory_space<vmem>>, vector<4x128xf32>
    tpu.vector_store %arg10[%c28, %c0_37], %55 {strides = array<i32>} : memref<72x128xf32, #tpu.memory_space<vmem>>, vector<4x128xf32>,
    %c0_38 = arith.constant 0 : index
    %c18 = arith.constant 18 : index
    %57 = vector.load %arg9[%c0_38, %c18] : memref<8x146xf32, #tpu.memory_space<vmem>>, vector<4x128xf32>
    %58 = vector.extract_strided_slice %0 {offsets = [8, 0], sizes = [1, 128], strides = [1, 1]} : vector<9x128xf32> to vector<1x128xf32>
    %59 = vector.broadcast %58 : vector<1x128xf32> to vector<4x128xf32>
    %60 = arith.mulf %57, %59 : vector<4x128xf32>
    %c32 = arith.constant 32 : index
    %c0_39 = arith.constant 0 : index
    %61 = vector.load %arg10[%c32, %c0_39] : memref<72x128xf32, #tpu.memory_space<vmem>>, vector<4x128xf32>
    tpu.vector_store %arg10[%c32, %c0_39], %60 {strides = array<i32>} : memref<72x128xf32, #tpu.memory_space<vmem>>, vector<4x128xf32>,
    %c0_40 = arith.constant 0 : index
    %c0_41 = arith.constant 0 : index
    %62 = vector.load %arg10[%c0_40, %c0_41] : memref<72x128xf32, #tpu.memory_space<vmem>>, vector<36x128xf32>
    %c0_42 = arith.constant 0 : index
    %c0_43 = arith.constant 0 : index
    %63 = vector.load %arg2[%c0_42, %c0_43] : memref<8x36xf32, #tpu.memory_space<vmem>>, vector<8x36xf32>
    %cst_44 = arith.constant dense<0.000000e+00> : vector<8x128xf32>
    %64 = tpu.matmul %63, %62, %cst_44 {dimension_numbers = #tpu.dot_dimension_numbers<[1], [0], [0], [1], [0, 0, 1, 1], [], []>} : vector<8x36xf32>, vector<36x128xf32>, vector<8x128xf32> -> vector<8x128xf32>
    %cst_45 = arith.constant dense<0.000000e+00> : vector<8xf32>
    %65 = vector.multi_reduction <add>, %64, %cst_45 [1] : vector<8x128xf32> to vector<8xf32>
    %66 = vector.shape_cast %65 : vector<8xf32> to vector<8x1xf32>
    %67 = arith.mulf %64, %64 : vector<8x128xf32>
    %cst_46 = arith.constant dense<0.000000e+00> : vector<8xf32>
    %68 = vector.multi_reduction <add>, %67, %cst_46 [1] : vector<8x128xf32> to vector<8xf32>
    %69 = vector.shape_cast %68 : vector<8xf32> to vector<8x1xf32>
    %cst_47 = arith.constant 1.280000e+02 : f32
    %70 = vector.broadcast %cst_47 : f32 to vector<8x1xf32>
    %71 = arith.divf %66, %70 : vector<8x1xf32>
    %cst_48 = arith.constant 1.280000e+02 : f32
    %72 = vector.broadcast %cst_48 : f32 to vector<8x1xf32>
    %73 = arith.divf %69, %72 : vector<8x1xf32>
    %74 = arith.mulf %71, %71 : vector<8x1xf32>
    %75 = arith.subf %73, %74 : vector<8x1xf32>
    %cst_49 = arith.constant 0.000000e+00 : f32
    %76 = vector.broadcast %cst_49 : f32 to vector<8x1xf32>
    %77 = arith.maximumf %75, %76 : vector<8x1xf32>
    %c0_50 = arith.constant 0 : index
    %c0_51 = arith.constant 0 : index
    %78 = vector.load %arg3[%c0_50, %c0_51] : memref<8x1xf32, #tpu.memory_space<vmem>>, vector<8x1xf32>
    %cst_52 = arith.constant 9.99999974E-6 : f32
    %79 = vector.broadcast %cst_52 : f32 to vector<8x1xf32>
    %80 = arith.addf %77, %79 : vector<8x1xf32>
    %81 = math.rsqrt %80 : vector<8x1xf32>
    %82 = arith.mulf %78, %81 : vector<8x1xf32>
    %c0_53 = arith.constant 0 : index
    %c0_54 = arith.constant 0 : index
    %83 = vector.load %arg4[%c0_53, %c0_54] : memref<8x1xf32, #tpu.memory_space<vmem>>, vector<8x1xf32>
    %84 = arith.mulf %71, %82 : vector<8x1xf32>
    %85 = arith.subf %83, %84 : vector<8x1xf32>
    %86 = vector.broadcast %82 : vector<8x1xf32> to vector<8x128xf32>
    %87 = arith.mulf %64, %86 : vector<8x128xf32>
    %88 = vector.broadcast %85 : vector<8x1xf32> to vector<8x128xf32>
    %89 = arith.addf %87, %88 : vector<8x128xf32>
    %cst_55 = arith.constant 0.000000e+00 : f32
    %90 = vector.broadcast %cst_55 : f32 to vector<8x128xf32>
    %91 = arith.maximumf %89, %90 : vector<8x128xf32>
    %cst_56 = arith.constant 0.000000e+00 : f32
    %92 = vector.broadcast %cst_56 : f32 to vector<8x9xf32>
    %c0_57 = arith.constant 0 : index
    %c0_58 = arith.constant 0 : index
    %93 = vector.load %arg9[%c0_57, %c0_58] : memref<8x146xf32, #tpu.memory_space<vmem>>, vector<8x9xf32>
    tpu.vector_store %arg9[%c0_57, %c0_58], %92 {strides = array<i32>} : memref<8x146xf32, #tpu.memory_space<vmem>>, vector<8x9xf32>,
    %c0_59 = arith.constant 0 : index
    %c9_60 = arith.constant 9 : index
    %94 = vector.load %arg9[%c0_59, %c9_60] : memref<8x146xf32, #tpu.memory_space<vmem>>, vector<8x128xf32>
    tpu.vector_store %arg9[%c0_59, %c9_60], %91 {strides = array<i32>} : memref<8x146xf32, #tpu.memory_space<vmem>>, vector<8x128xf32>,
    %cst_61 = arith.constant 0.000000e+00 : f32
    %95 = vector.broadcast %cst_61 : f32 to vector<8x9xf32>
    %c0_62 = arith.constant 0 : index
    %c137_63 = arith.constant 137 : index
    %96 = vector.load %arg9[%c0_62, %c137_63] : memref<8x146xf32, #tpu.memory_space<vmem>>, vector<8x9xf32>
    tpu.vector_store %arg9[%c0_62, %c137_63], %95 {strides = array<i32>} : memref<8x146xf32, #tpu.memory_space<vmem>>, vector<8x9xf32>,
    %c0_64 = arith.constant 0 : index
    %c0_65 = arith.constant 0 : index
    %97 = vector.load %arg9[%c0_64, %c0_65] : memref<8x146xf32, #tpu.memory_space<vmem>>, vector<8x128xf32>
    %98 = vector.extract_strided_slice %0 {offsets = [0, 0], sizes = [1, 128], strides = [1, 1]} : vector<9x128xf32> to vector<1x128xf32>
    %99 = vector.broadcast %98 : vector<1x128xf32> to vector<8x128xf32>
    %100 = arith.mulf %97, %99 : vector<8x128xf32>
    %c0_66 = arith.constant 0 : index
    %c0_67 = arith.constant 0 : index
    %101 = vector.load %arg10[%c0_66, %c0_67] : memref<72x128xf32, #tpu.memory_space<vmem>>, vector<8x128xf32>
    tpu.vector_store %arg10[%c0_66, %c0_67], %100 {strides = array<i32>} : memref<72x128xf32, #tpu.memory_space<vmem>>, vector<8x128xf32>,
    %c0_68 = arith.constant 0 : index
    %c1_69 = arith.constant 1 : index
    %102 = vector.load %arg9[%c0_68, %c1_69] : memref<8x146xf32, #tpu.memory_space<vmem>>, vector<8x128xf32>
    %103 = vector.extract_strided_slice %0 {offsets = [1, 0], sizes = [1, 128], strides = [1, 1]} : vector<9x128xf32> to vector<1x128xf32>
    %104 = vector.broadcast %103 : vector<1x128xf32> to vector<8x128xf32>
    %105 = arith.mulf %102, %104 : vector<8x128xf32>
    %c8_70 = arith.constant 8 : index
    %c0_71 = arith.constant 0 : index
    %106 = vector.load %arg10[%c8_70, %c0_71] : memref<72x128xf32, #tpu.memory_space<vmem>>, vector<8x128xf32>
    tpu.vector_store %arg10[%c8_70, %c0_71], %105 {strides = array<i32>} : memref<72x128xf32, #tpu.memory_space<vmem>>, vector<8x128xf32>,
    %c0_72 = arith.constant 0 : index
    %c2_73 = arith.constant 2 : index
    %107 = vector.load %arg9[%c0_72, %c2_73] : memref<8x146xf32, #tpu.memory_space<vmem>>, vector<8x128xf32>
    %108 = vector.extract_strided_slice %0 {offsets = [2, 0], sizes = [1, 128], strides = [1, 1]} : vector<9x128xf32> to vector<1x128xf32>
    %109 = vector.broadcast %108 : vector<1x128xf32> to vector<8x128xf32>
    %110 = arith.mulf %107, %109 : vector<8x128xf32>
    %c16_74 = arith.constant 16 : index
    %c0_75 = arith.constant 0 : index
    %111 = vector.load %arg10[%c16_74, %c0_75] : memref<72x128xf32, #tpu.memory_space<vmem>>, vector<8x128xf32>
    tpu.vector_store %arg10[%c16_74, %c0_75], %110 {strides = array<i32>} : memref<72x128xf32, #tpu.memory_space<vmem>>, vector<8x128xf32>,
    %c0_76 = arith.constant 0 : index
    %c8_77 = arith.constant 8 : index
    %112 = vector.load %arg9[%c0_76, %c8_77] : memref<8x146xf32, #tpu.memory_space<vmem>>, vector<8x128xf32>
    %113 = vector.extract_strided_slice %0 {offsets = [3, 0], sizes = [1, 128], strides = [1, 1]} : vector<9x128xf32> to vector<1x128xf32>
    %114 = vector.broadcast %113 : vector<1x128xf32> to vector<8x128xf32>
    %115 = arith.mulf %112, %114 : vector<8x128xf32>
    %c24_78 = arith.constant 24 : index
    %c0_79 = arith.constant 0 : index
    %116 = vector.load %arg10[%c24_78, %c0_79] : memref<72x128xf32, #tpu.memory_space<vmem>>, vector<8x128xf32>
    tpu.vector_store %arg10[%c24_78, %c0_79], %115 {strides = array<i32>} : memref<72x128xf32, #tpu.memory_space<vmem>>, vector<8x128xf32>,
    %c0_80 = arith.constant 0 : index
    %c9_81 = arith.constant 9 : index
    %117 = vector.load %arg9[%c0_80, %c9_81] : memref<8x146xf32, #tpu.memory_space<vmem>>, vector<8x128xf32>
    %118 = vector.extract_strided_slice %0 {offsets = [4, 0], sizes = [1, 128], strides = [1, 1]} : vector<9x128xf32> to vector<1x128xf32>
    %119 = vector.broadcast %118 : vector<1x128xf32> to vector<8x128xf32>
    %120 = arith.mulf %117, %119 : vector<8x128xf32>
    %c32_82 = arith.constant 32 : index
    %c0_83 = arith.constant 0 : index
    %121 = vector.load %arg10[%c32_82, %c0_83] : memref<72x128xf32, #tpu.memory_space<vmem>>, vector<8x128xf32>
    tpu.vector_store %arg10[%c32_82, %c0_83], %120 {strides = array<i32>} : memref<72x128xf32, #tpu.memory_space<vmem>>, vector<8x128xf32>,
    %c0_84 = arith.constant 0 : index
    %c10_85 = arith.constant 10 : index
    %122 = vector.load %arg9[%c0_84, %c10_85] : memref<8x146xf32, #tpu.memory_space<vmem>>, vector<8x128xf32>
    %123 = vector.extract_strided_slice %0 {offsets = [5, 0], sizes = [1, 128], strides = [1, 1]} : vector<9x128xf32> to vector<1x128xf32>
    %124 = vector.broadcast %123 : vector<1x128xf32> to vector<8x128xf32>
    %125 = arith.mulf %122, %124 : vector<8x128xf32>
    %c40 = arith.constant 40 : index
    %c0_86 = arith.constant 0 : index
    %126 = vector.load %arg10[%c40, %c0_86] : memref<72x128xf32, #tpu.memory_space<vmem>>, vector<8x128xf32>
    tpu.vector_store %arg10[%c40, %c0_86], %125 {strides = array<i32>} : memref<72x128xf32, #tpu.memory_space<vmem>>, vector<8x128xf32>,
    %c0_87 = arith.constant 0 : index
    %c16_88 = arith.constant 16 : index
    %127 = vector.load %arg9[%c0_87, %c16_88] : memref<8x146xf32, #tpu.memory_space<vmem>>, vector<8x128xf32>
    %128 = vector.extract_strided_slice %0 {offsets = [6, 0], sizes = [1, 128], strides = [1, 1]} : vector<9x128xf32> to vector<1x128xf32>
    %129 = vector.broadcast %128 : vector<1x128xf32> to vector<8x128xf32>
    %130 = arith.mulf %127, %129 : vector<8x128xf32>
    %c48 = arith.constant 48 : index
    %c0_89 = arith.constant 0 : index
    %131 = vector.load %arg10[%c48, %c0_89] : memref<72x128xf32, #tpu.memory_space<vmem>>, vector<8x128xf32>
    tpu.vector_store %arg10[%c48, %c0_89], %130 {strides = array<i32>} : memref<72x128xf32, #tpu.memory_space<vmem>>, vector<8x128xf32>,
    %c0_90 = arith.constant 0 : index
    %c17_91 = arith.constant 17 : index
    %132 = vector.load %arg9[%c0_90, %c17_91] : memref<8x146xf32, #tpu.memory_space<vmem>>, vector<8x128xf32>
    %133 = vector.extract_strided_slice %0 {offsets = [7, 0], sizes = [1, 128], strides = [1, 1]} : vector<9x128xf32> to vector<1x128xf32>
    %134 = vector.broadcast %133 : vector<1x128xf32> to vector<8x128xf32>
    %135 = arith.mulf %132, %134 : vector<8x128xf32>
    %c56 = arith.constant 56 : index
    %c0_92 = arith.constant 0 : index
    %136 = vector.load %arg10[%c56, %c0_92] : memref<72x128xf32, #tpu.memory_space<vmem>>, vector<8x128xf32>
    tpu.vector_store %arg10[%c56, %c0_92], %135 {strides = array<i32>} : memref<72x128xf32, #tpu.memory_space<vmem>>, vector<8x128xf32>,
    %c0_93 = arith.constant 0 : index
    %c18_94 = arith.constant 18 : index
    %137 = vector.load %arg9[%c0_93, %c18_94] : memref<8x146xf32, #tpu.memory_space<vmem>>, vector<8x128xf32>
    %138 = vector.extract_strided_slice %0 {offsets = [8, 0], sizes = [1, 128], strides = [1, 1]} : vector<9x128xf32> to vector<1x128xf32>
    %139 = vector.broadcast %138 : vector<1x128xf32> to vector<8x128xf32>
    %140 = arith.mulf %137, %139 : vector<8x128xf32>
    %c64 = arith.constant 64 : index
    %c0_95 = arith.constant 0 : index
    %141 = vector.load %arg10[%c64, %c0_95] : memref<72x128xf32, #tpu.memory_space<vmem>>, vector<8x128xf32>
    tpu.vector_store %arg10[%c64, %c0_95], %140 {strides = array<i32>} : memref<72x128xf32, #tpu.memory_space<vmem>>, vector<8x128xf32>,
    %c0_96 = arith.constant 0 : index
    %c0_97 = arith.constant 0 : index
    %142 = vector.load %arg10[%c0_96, %c0_97] : memref<72x128xf32, #tpu.memory_space<vmem>>, vector<72x128xf32>
    %c0_98 = arith.constant 0 : index
    %c0_99 = arith.constant 0 : index
    %143 = vector.load %arg5[%c0_98, %c0_99] : memref<8x72xf32, #tpu.memory_space<vmem>>, vector<8x72xf32>
    %cst_100 = arith.constant dense<0.000000e+00> : vector<8x128xf32>
    %144 = tpu.matmul %143, %142, %cst_100 {dimension_numbers = #tpu.dot_dimension_numbers<[1], [0], [0], [1], [0, 0, 1, 1], [], []>} : vector<8x72xf32>, vector<72x128xf32>, vector<8x128xf32> -> vector<8x128xf32>
    %cst_101 = arith.constant dense<0.000000e+00> : vector<8xf32>
    %145 = vector.multi_reduction <add>, %144, %cst_101 [1] : vector<8x128xf32> to vector<8xf32>
    %146 = vector.shape_cast %145 : vector<8xf32> to vector<8x1xf32>
    %147 = arith.mulf %144, %144 : vector<8x128xf32>
    %cst_102 = arith.constant dense<0.000000e+00> : vector<8xf32>
    %148 = vector.multi_reduction <add>, %147, %cst_102 [1] : vector<8x128xf32> to vector<8xf32>
    %149 = vector.shape_cast %148 : vector<8xf32> to vector<8x1xf32>
    %cst_103 = arith.constant 1.280000e+02 : f32
    %150 = vector.broadcast %cst_103 : f32 to vector<8x1xf32>
    %151 = arith.divf %146, %150 : vector<8x1xf32>
    %cst_104 = arith.constant 1.280000e+02 : f32
    %152 = vector.broadcast %cst_104 : f32 to vector<8x1xf32>
    %153 = arith.divf %149, %152 : vector<8x1xf32>
    %154 = arith.mulf %151, %151 : vector<8x1xf32>
    %155 = arith.subf %153, %154 : vector<8x1xf32>
    %cst_105 = arith.constant 0.000000e+00 : f32
    %156 = vector.broadcast %cst_105 : f32 to vector<8x1xf32>
    %157 = arith.maximumf %155, %156 : vector<8x1xf32>
    %c0_106 = arith.constant 0 : index
    %c0_107 = arith.constant 0 : index
    %158 = vector.load %arg6[%c0_106, %c0_107] : memref<8x1xf32, #tpu.memory_space<vmem>>, vector<8x1xf32>
    %cst_108 = arith.constant 9.99999974E-6 : f32
    %159 = vector.broadcast %cst_108 : f32 to vector<8x1xf32>
    %160 = arith.addf %157, %159 : vector<8x1xf32>
    %161 = math.rsqrt %160 : vector<8x1xf32>
    %162 = arith.mulf %158, %161 : vector<8x1xf32>
    %c0_109 = arith.constant 0 : index
    %c0_110 = arith.constant 0 : index
    %163 = vector.load %arg7[%c0_109, %c0_110] : memref<8x1xf32, #tpu.memory_space<vmem>>, vector<8x1xf32>
    %164 = arith.mulf %151, %162 : vector<8x1xf32>
    %165 = arith.subf %163, %164 : vector<8x1xf32>
    %166 = vector.broadcast %162 : vector<8x1xf32> to vector<8x128xf32>
    %167 = arith.mulf %144, %166 : vector<8x128xf32>
    %168 = vector.broadcast %165 : vector<8x1xf32> to vector<8x128xf32>
    %169 = arith.addf %167, %168 : vector<8x128xf32>
    %cst_111 = arith.constant 0.000000e+00 : f32
    %170 = vector.broadcast %cst_111 : f32 to vector<8x128xf32>
    %171 = arith.maximumf %169, %170 : vector<8x128xf32>
    %c0_112 = arith.constant 0 : index
    %c0_113 = arith.constant 0 : index
    %172 = vector.load %arg8[%c0_112, %c0_113] : memref<8x128xf32, #tpu.memory_space<vmem>>, vector<8x128xf32>
    tpu.vector_store %arg8[%c0_112, %c0_113], %171 {strides = array<i32>} : memref<8x128xf32, #tpu.memory_space<vmem>>, vector<8x128xf32>,
    return
  }
}

</mosaic_0001>

<bundles_post_ra>
// kernel: tpu_custom_call.1
= control target key start
LH: loop header
LB: loop body
LE: loop exit
PB: predicated region body
PF: predicated region fallthrough
CT: control target
= control target key end

     0   :  { %13 = vsyncpa [#allocation5], 0  ;;  %s875_s0 = inlined_call_operand.vmem [shape: f32[4,4,128], index: 0, kind: input, shape index: {}]   ;;  %s876_s1 = inlined_call_operand.vmem [shape: f32[9,128], index: 1, kind: input, shape index: {}]   ;;  %s877_s2 = inlined_call_operand.hbm [shape: f32[8,36], index: 2, kind: input, shape index: {}]   ;;  %s878_s3 = inlined_call_operand.vmem [shape: f32[8,1], index: 3, kind: input, shape index: {}]   ;;  %s879_s4 = inlined_call_operand.vmem [shape: f32[8,1], index: 4, kind: input, shape index: {}]   ;;  %s880_s5 = inlined_call_operand.hbm [shape: f32[8,72], index: 5, kind: input, shape index: {}]   ;;  %s881_s6 = inlined_call_operand.vmem [shape: f32[8,1], index: 6, kind: input, shape index: {}]   ;;  %s882_s7 = inlined_call_operand.vmem [shape: f32[8,1], index: 7, kind: input, shape index: {}]   ;;  %s883_s8 = inlined_call_operand.hbm [shape: f32[8,128], index: 8, kind: output, shape index: {}]  }
   0x1   :  { %14 = vsyncpa [#allocation8], 0 }
   0x2   :  { %15 = vsyncpa [#allocation6], 0  ;;  %s25_s29 = sshll.u32 %s877_s2, 4  ;;  %s642_s30 = smov [#allocation4]   ;;  %s26_s29 = int_to_ptr.hbm [resolvable:$true] %s25_s29 }
   0x3   :  { %s27_s9 = sshll.u32 %s642_s30, 4  ;;  %s40_s12 = sshll.u32 %s880_s5, 4  ;;  %s28_s9 = int_to_ptr.vmem [resolvable:$true] %s27_s9  ;;  %s41_s12 = int_to_ptr.hbm [resolvable:$true] %s40_s12 }
   0x4   :  { %30 = dma.hbm_to_vmem [thread:$0]  %s26_s29, 128, %s28_s9, [#allocation5]  }
   0x5   :  { %s643_s13 = smov [#allocation7]  }
   0x6   :  { %s42_s14 = sshll.u32 %s643_s13, 4  ;;  %s43_s14 = int_to_ptr.vmem [resolvable:$true] %s42_s14 }
   0x7   :  { %45 = dma.hbm_to_vmem [thread:$0]  %s41_s12, 128, %s43_s14, [#allocation8]  }
   0x8   :  { %636 = dma.done.wait [#allocation5], 128  }
   0x9   :  { %637 = vsyncadd [#allocation5], 4294967168 }
   0xa   :  { %638 = dma.done.wait [#allocation8], 128  }
   0xb   :  { %639 = vsyncadd [#allocation8], 4294967168  ;;  %v718_v0 = vld [vmem:[%s876_s1] sm:$0xff]  ;;  %v528_v5 = vld [vmem:[%s875_s0 + $0x8] sm:$0xf]  ;;  %s644_s23 = smov 16  }
   0xc   :  { %v60_v1 = vld [vmem:[%s875_s0] sm:$0xf]  ;;  %v527_v2 = vld [vmem:[%s875_s0 + $0x4] sm:$0xf]  ;;  %v182_v3 = vperm.slane %v718_v0, 6  ;;  %v144_v8 = vperm.slane %v718_v0, 4 }
   0xd   :  { %v63_v4 = vmax.f32 %v60_v1, %v527_v2  ;;  %v529_v6 = vld [vmem:[%s875_s0 + $0xc] sm:$0xf]  ;;  %s645_s24 = smov 9   ;;  %v201_v10 = vperm.slane %v718_v0, 7  ;;  %v163_v11 = vperm.slane %v718_v0, 5  ;;  %s646_s0 = smov 17  }
   0xe   :  { %v68_v7 = vmax.f32 %v528_v5, %v529_v6  ;;  %184 = vrot.lane.b32.xlu1 %v182_v3, %s644_s23  ;;  %146 = vrot.lane.b32.xlu2 %v144_v8, %s645_s24  ;;  %v557_v12 = vld [vmem:[%s876_s1 + $0x8] ss:$0 sm:$0xff]  ;;  %s647_s27 = smov 10   ;;  %s648_s28 = smov 18   ;;  %v125_v13 = vperm.slane %v718_v0, 3  ;;  %v87_v14 = vperm.slane %v718_v0, 1 }
   0xf   :  { %v106_v15 = vperm.slane %v718_v0, 2  ;;  %s649_s29 = smov 8   ;;  %s650_s30 = smov 1   ;;  %vm70_vm0 = vcmask 68608   ;;  %v652_v16 = vmov 0.0   ;;  %vm76_vm1 = vcmask 1043528  }
  0x10   :  { %v69_v9 = vmax.f32 %v63_v4, %v68_v7  ;;  %s651_s9 = smov 2   ;;  %71 = vst.msk [vmem:[#allocation2] sm:$0xf] %vm70_vm0, %v652_v16  ;;  %vm79_vm2 = vcmask 142408   ;;  %v82_v28 = vperm.slane %v718_v0, 0  ;;  %s653_s1 = smov 111  }
  0x11   :  { %s654_s10 = smov 110   ;;  %s655_s11 = smov 112   ;;  %vm214_vm3 = vcmask 908288   ;;  %vm119_vm4 = vcmask 1031168   ;;  %vm233_vm5 = vcmask 900096   ;;  %vm157_vm6 = vcmask 973824  }
  0x12   :  { %73 = vrot.lane.b32.xlu0 %v69_v9, %s645_s24  ;;  %s656_s12 = smov 119   ;;  %s657_s13 = smov 126   ;;  %vm195_vm7 = vcmask 916480   ;;  %vm247_vm8 = vcmask 1043456   ;;  %vm138_vm9 = vcmask 982016   ;;  %vm176_vm10 = vcmask 965632  }
  0x13   :  { %s658_s14 = smov 118   ;;  %s659_s15 = smov 120   ;;  %vm100_vm11 = vcmask 1039360   ;;  %vm243_vm12 = vcmask 293888  }
  0x14   :  { %s660_s2 = smov 127   ;;  %s663_s21 = smov [#allocation9]  }
  0x15   :  { %s514_s22 = sshll.u32 %s663_s21, 4  ;;  %s515_s22 = int_to_ptr.vmem [resolvable:$true] %s514_s22 }
  0x16   :  { %203 = vrot.lane.b32.xlu1 %v201_v10, %s646_s0  ;;  %165 = vrot.lane.b32.xlu2 %v163_v11, %s647_s27 }
  0x1a   :  { %222 = vrot.lane.b32.xlu0 %v557_v12, %s648_s28 }
  0x1e   :  { %127 = vrot.lane.b32.xlu1 %v125_v13, %s649_s29  ;;  %89 = vrot.lane.b32.xlu2 %v87_v14, %s650_s30 }
  0x22   :  { %108 = vrot.lane.b32.xlu0 %v106_v15, %s651_s9 }
  0x68   :  { %v748_v19 = vpop.permute.xlu2 %146 }
  0x70   :  { %v765_v35 = vpop.permute.xlu2 %165 }
  0x78   :  { %v787_v54 = vpop.permute.xlu2 %89 }
  0x80   :  { %v745_v17 = vpop.permute.xlu1 %184 }
  0x84   :  { %v74_v18 = vpop.permute.xlu0 %73 }
  0x85   :  { %77 = vst.msk [vmem:[#allocation2] sm:$0xf] %vm76_vm1, %v74_v18  ;;  %vm317_vm1 = vcmask 72704  }
  0x86   :  { %78 = vst.msk [vmem:[#allocation2 + $0x8] sm:$0xf] %vm70_vm0, %v74_v18 }
  0x87   :  { %80 = vst.msk [vmem:[#allocation2 + $0x8] sm:$0xf] %vm79_vm2, %v652_v16  ;;  %vm323_vm2 = vcmask 1047624  }
  0x88   :  { %v750_v20 = vpop.permute.xlu1 %203 }
  0x8c   :  { %v752_v21 = vpop.permute.xlu0 %222  ;;  %v199_v22 = vld [vmem:[#allocation2] sm:$0xf] }
  0x8d   :  { %v218_v23 = vld [vmem:[#allocation2] sm:$0xf]  ;;  %v206_v25 = vmul.f32 %v750_v20, %v199_v22 }
  0x8e   :  { %v180_v24 = vld [vmem:[#allocation2] sm:$0xf]  ;;  %v225_v26 = vmul.f32 %v752_v21, %v218_v23  ;;  %v219_v40 = vld [vmem:[#allocation2 + $0x8] sm:$0xf] }
  0x8f   :  { %v187_v27 = vmul.f32 %v745_v17, %v180_v24  ;;  %210 = vrot.lane.b32.xlu1 %v206_v25, %s653_s1  ;;  %v81_v29 = vld [vmem:[#allocation2] sm:$0xf]  ;;  %v200_v41 = vld [vmem:[#allocation2 + $0x8] sm:$0xf]  ;;  %v226_v44 = vmul.f32 %v752_v21, %v219_v40 }
  0x90   :  { %229 = vrot.lane.b32.xlu0 %v225_v26, %s654_s10  ;;  %v142_v30 = vld [vmem:[#allocation2] sm:$0xf]  ;;  %v83_v31 = vmul.f32 %v82_v28, %v81_v29  ;;  %v773_v39 = vpop.permute.xlu1 %127  ;;  %v207_v45 = vmul.f32 %v750_v20, %v200_v41  ;;  %v181_v46 = vld [vmem:[#allocation2 + $0x8] sm:$0xf] }
  0x91   :  { %191 = vrot.lane.b32.xlu2 %v187_v27, %s655_s11  ;;  %v161_v32 = vld [vmem:[#allocation2] sm:$0xf]  ;;  %v149_v36 = vmul.f32 %v748_v19, %v142_v30  ;;  %v143_v47 = vld [vmem:[#allocation2 + $0x8] sm:$0xf]  ;;  %v188_v49 = vmul.f32 %v745_v17, %v181_v46 }
  0x92   :  { %v104_v34 = vld [vmem:[#allocation2] sm:$0xf]  ;;  %84 = vst [vmem:[#allocation3] sm:$0xf] %v83_v31  ;;  %v168_v38 = vmul.f32 %v765_v35, %v161_v32  ;;  %v105_v48 = vld [vmem:[#allocation2 + $0x8] sm:$0xf]  ;;  %v150_v50 = vmul.f32 %v748_v19, %v143_v47 }
  0x93   :  { %v123_v42 = vld [vmem:[#allocation2] sm:$0xf]  ;;  %v162_v52 = vld [vmem:[#allocation2 + $0x8] sm:$0xf]  ;;  %v242_v32 = vld [vmem:[#allocation4] sm:$0xff] }
  0x94   :  { %v763_v33 = vpop.permute.xlu0 %108  ;;  %v130_v43 = vmul.f32 %v773_v39, %v123_v42  ;;  %v124_v53 = vld [vmem:[#allocation2 + $0x8] sm:$0xf]  ;;  %v169_v55 = vmul.f32 %v765_v35, %v162_v52  ;;  %v85_v56 = vld [vmem:[#allocation2] sm:$0xf] }
  0x95   :  { %v111_v37 = vmul.f32 %v763_v33, %v104_v34  ;;  %v112_v51 = vmul.f32 %v763_v33, %v105_v48  ;;  %v131_v57 = vmul.f32 %v773_v39, %v124_v53  ;;  %v92_v58 = vmul.f32 %v787_v54, %v85_v56  ;;  %v86_v59 = vld [vmem:[#allocation2 + $0x8] sm:$0xf]  ;;  %318 = vst.msk [vmem:[#allocation2] sm:$0xff] %vm317_vm1, %v652_v16 }
  0x96   :  { %v93_v60 = vmul.f32 %v787_v54, %v86_v59 }
  0x97   :  { %115 = vrot.lane.b32.xlu1 %v111_v37, %s657_s13 }
  0x98   :  { %153 = vrot.lane.b32.xlu0 %v149_v36, %s656_s12 }
  0x99   :  { %172 = vrot.lane.b32.xlu2 %v168_v38, %s658_s14  ;;  %v661_v38 = vmov 128.0  }
  0x9a   :  { %558 = vrcp.f32 %v661_v38 }
  0x9f   :  { %231 = vrot.lane.b32.xlu1 %v226_v44, %s654_s10  ;;  %v662_v44 = vmov 0  }
  0xa0   :  { %134 = vrot.lane.b32.xlu0 %v130_v43, %s659_s15  ;;  %v559_v40 = vpop.eup %558  ;;  %556 = vset.pattern.permute.xlu2 %v662_v44 }
  0xa1   :  { %212 = vrot.lane.b32.xlu2 %v207_v45, %s653_s1  ;;  %v277_v41 = vmul.f32 128.0, %v559_v40  ;;  %555 = vset.pattern.permute.xlu0 %v662_v44  ;;  %vm281_vm13 = vweird.f32 %v559_v40 }
  0xa3   :  { %v278_v42 = vsub.f32 1.0, %v277_v41 }
  0xa5   :  { %v279_v43 = vmul.f32 %v559_v40, %v278_v42 }
  0xa7   :  { %155 = vrot.lane.b32.xlu1 %v150_v50, %s656_s12  ;;  %v280_v45 = vadd.f32 %v559_v40, %v279_v43 }
  0xa8   :  { %193 = vrot.lane.b32.xlu0 %v188_v49, %s655_s11 }
  0xa9   :  { %117 = vrot.lane.b32.xlu2 %v112_v51, %s657_s13  ;;  %v805_v46 = vsel %vm281_vm13, %v559_v40, %v280_v45 }
  0xaf   :  { %136 = vrot.lane.b32.xlu1 %v131_v57, %s659_s15 }
  0xb0   :  { %174 = vrot.lane.b32.xlu0 %v169_v55, %s658_s14 }
  0xb1   :  { %96 = vrot.lane.b32.xlu2 %v92_v58, %s660_s2 }
  0xb8   :  { %98 = vrot.lane.b32.xlu0 %v93_v60, %s660_s2 }
  0xeb   :  { %v192_v61 = vpop.permute.xlu2 %191 }
  0xf3   :  { %v173_v62 = vpop.permute.xlu2 %172 }
  0xfb   :  { %v213_v63 = vpop.permute.xlu2 %212 }
 0x101   :  { %v211_v1 = vpop.permute.xlu1 %210 }
 0x102   :  { %v230_v2 = vpop.permute.xlu0 %229  ;;  %v215_v3 = vsel %vm214_vm3, %v211_v1, %v213_v63 }
 0x103   :  { %217 = vst [vmem:[#allocation3 + $0x1c] sm:$0xf] %v215_v3  ;;  %v118_v4 = vpop.permute.xlu2 %117  ;;  %v301_v3 = vld [vmem:[%s879_s4] sm:$0xff] }
 0x109   :  { %v116_v5 = vpop.permute.xlu1 %115 }
 0x10a   :  { %v154_v6 = vpop.permute.xlu0 %153  ;;  %v120_v7 = vsel %vm119_vm4, %v116_v5, %v118_v4 }
 0x10b   :  { %122 = vst [vmem:[#allocation3 + $0x8] sm:$0xf] %v120_v7  ;;  %v97_v26 = vpop.permute.xlu2 %96 }
 0x111   :  { %v232_v8 = vpop.permute.xlu1 %231 }
 0x112   :  { %v135_v9 = vpop.permute.xlu0 %134  ;;  %v234_v10 = vsel %vm233_vm5, %v230_v2, %v232_v8 }
 0x113   :  { %236 = vst [vmem:[#allocation3 + $0x20] sm:$0xf] %v234_v10 }
 0x119   :  { %v156_v11 = vpop.permute.xlu1 %155 }
 0x11a   :  { %v194_v12 = vpop.permute.xlu0 %193  ;;  %v158_v13 = vsel %vm157_vm6, %v154_v6, %v156_v11  ;;  %v241_v15 = vld [vmem:[#allocation3 + $0x20] sm:$0xf] }
 0x11b   :  { %v196_v14 = vsel %vm195_vm7, %v192_v61, %v194_v12  ;;  %160 = vst [vmem:[#allocation3 + $0x10] sm:$0xf] %v158_v13  ;;  %530 = vmatpush.msk.msra.mxu0 %vm247_vm8, %v241_v15  ;;  %v288_v61 = vld [vmem:[%s878_s3] sm:$0xff]  ;;  %vm326_vm8 = vcmask 146504  }
 0x11c   :  { %198 = vst [vmem:[#allocation3 + $0x18] sm:$0xf] %v196_v14 }
 0x121   :  { %v137_v18 = vpop.permute.xlu1 %136 }
 0x122   :  { %v175_v22 = vpop.permute.xlu0 %174  ;;  %v139_v23 = vsel %vm138_vm9, %v135_v9, %v137_v18 }
 0x123   :  { %v177_v24 = vsel %vm176_vm10, %v173_v62, %v175_v22  ;;  %141 = vst [vmem:[#allocation3 + $0xc] sm:$0xf] %v139_v23  ;;  %v240_v25 = vld [vmem:[#allocation3 + $0x18] sm:$0xff] }
 0x124   :  { %179 = vst [vmem:[#allocation3 + $0x14] sm:$0xf] %v177_v24  ;;  %263 = vmatpush.msra.mxu0 %v240_v25 }
 0x12a   :  { %v99_v27 = vpop.permute.xlu0 %98  ;;  %v238_v31 = vld [vmem:[#allocation3 + $0x8] sm:$0xff] }
 0x12b   :  { %v101_v29 = vsel %vm100_vm11, %v97_v26, %v99_v27  ;;  %v239_v30 = vld [vmem:[#allocation3 + $0x10] sm:$0xff] }
 0x12c   :  { %103 = vst [vmem:[#allocation3 + $0x4] sm:$0xf] %v101_v29  ;;  %264 = vmatpush.msra.mxu0 %v239_v30 }
 0x12e   :  { %265 = vmatpush.msra.mxu0 %v238_v31 }
 0x133   :  { %v237_v34 = vld [vmem:[#allocation3] sm:$0xff] }
 0x134   :  { %266 = vmatpush.msra.mxu0 %v237_v34 }
 0x135   :  { %531 = vmatmul.msk.f32.vlgmr.msra.gmra.mxu0 %vm243_vm12, %v242_v32 }
 0x1b2   :  { %v268_v36 = vpop.f32.mrf.mxu0 }
 0x1b3   :  { %271 = vadd.xlane.f32.xlu1 %v268_v36  ;;  %v273_v37 = vmul.f32 %v268_v36, %v268_v36 }
 0x1b5   :  { %274 = vadd.xlane.f32.xlu2 %v273_v37 }
 0x226   :  { %v272_v47 = vpop.xlane.xlu1 %271 }
 0x227   :  { %v283_v48 = vmul.f32 %v805_v46, %v272_v47 }
 0x228   :  { %v275_v49 = vpop.xlane.xlu2 %274 }
 0x229   :  { %v285_v50 = vmul.f32 %v283_v48, %v283_v48  ;;  %v284_v51 = vmul.f32 %v805_v46, %v275_v49 }
 0x22b   :  { %v286_v52 = vsub.f32 %v284_v51, %v285_v50 }
 0x22d   :  { %v287_v53 = vmax.f32 %v286_v52, 0.0 }
 0x22f   :  { %v289_v55 = vadd.f32 1e-05, %v287_v53  ;;  %v444_v53 = vld [vmem:[#allocation7] sm:$0xff] }
 0x231   :  { %560 = vrsqrt.f32 %v289_v55  ;;  %vm296_vm15 = vweird.f32 %v289_v55 }
 0x237   :  { %v561_v56 = vpop.eup %560 }
 0x238   :  { %v291_v57 = vmul.f32 %v561_v56, %v289_v55  ;;  %vm297_vm14 = vweird.f32 %v561_v56 }
 0x239   :  { %vm298_vm0 = vmor %vm296_vm15, %vm297_vm14 }
 0x23a   :  { %v292_v58 = vmul.f32 %v561_v56, %v291_v57 }
 0x23c   :  { %v293_v59 = vmul.f32 0.5, %v292_v58 }
 0x23e   :  { %v294_v60 = vsub.f32 1.5, %v293_v59 }
 0x240   :  { %v295_v62 = vmul.f32 %v561_v56, %v294_v60 }
 0x242   :  { %v299_v63 = vsel %vm298_vm0, %v561_v56, %v295_v62 }
 0x243   :  { %v300_v1 = vmul.f32 %v299_v63, %v288_v61 }
 0x245   :  { %306 = vperm.xlu0 %555, %v300_v1   ;;  %v302_v2 = vmul.f32 %v300_v1, %v283_v48 }
 0x247   :  { %v303_v4 = vsub.f32 %v301_v3, %v302_v2 }
 0x24d   :  { %312 = vperm.xlu0 %555, %v303_v4  }
 0x2b7   :  { %v307_v5 = vpop.permute.xlu0 %306 }
 0x2b8   :  { %v309_v6 = vmul.f32 %v307_v5, %v268_v36 }
 0x2bf   :  { %v313_v7 = vpop.permute.xlu0 %312 }
 0x2c0   :  { %v315_v8 = vadd.f32 %v313_v7, %v309_v6  ;;  %v479_v7 = vld [vmem:[%s881_s6] sm:$0xff]  ;;  %s516_s6 = sshll.u32 %s883_s8, 4  ;;  %s517_s6 = int_to_ptr.hbm [resolvable:$true] %s516_s6 }
 0x2c2   :  { %v316_v9 = vmax.f32 %v315_v8, 0.0 }
 0x2c4   :  { %320 = vrot.lane.b32.xlu0 %v316_v9, %s645_s24 }
 0x336   :  { %v321_v10 = vpop.permute.xlu0 %320 }
 0x337   :  { %324 = vst.msk [vmem:[#allocation2] sm:$0xff] %vm323_vm2, %v321_v10 }
 0x338   :  { %325 = vst.msk [vmem:[#allocation2 + $0x8] sm:$0xff] %vm317_vm1, %v321_v10 }
 0x339   :  { %327 = vst.msk [vmem:[#allocation2 + $0x8] sm:$0xff] %vm326_vm8, %v652_v16 }
 0x33e   :  { %v328_v11 = vld [vmem:[#allocation2] sm:$0xff] }
 0x33f   :  { %v820_v12 = vmul.f32 %v328_v11, %v82_v28  ;;  %v424_v13 = vmul.f32 %v328_v11, %v752_v21  ;;  %v411_v14 = vmul.f32 %v328_v11, %v750_v20  ;;  %v385_v15 = vmul.f32 %v328_v11, %v765_v35 }
 0x340   :  { %v398_v16 = vmul.f32 %v328_v11, %v745_v17  ;;  %v359_v0 = vmul.f32 %v328_v11, %v773_v39  ;;  %v346_v28 = vmul.f32 %v328_v11, %v763_v33  ;;  %v384_v18 = vld [vmem:[#allocation2 + $0x8] sm:$0xff]  ;;  %v372_v22 = vmul.f32 %v328_v11, %v748_v19 }
 0x341   :  { %330 = vst [vmem:[#allocation3] sm:$0xff] %v820_v12  ;;  %428 = vrot.lane.b32.xlu0 %v424_v13, %s654_s10  ;;  %415 = vrot.lane.b32.xlu1 %v411_v14, %s653_s1  ;;  %v386_v23 = vmul.f32 %v384_v18, %v765_v35  ;;  %v425_v24 = vmul.f32 %v384_v18, %v752_v21 }
 0x342   :  { %389 = vrot.lane.b32.xlu2 %v385_v15, %s658_s14  ;;  %v412_v25 = vmul.f32 %v384_v18, %v750_v20  ;;  %v347_v26 = vmul.f32 %v384_v18, %v763_v33  ;;  %v373_v27 = vmul.f32 %v384_v18, %v748_v19  ;;  %v399_v21 = vmul.f32 %v384_v18, %v745_v17 }
 0x343   :  { %v334_v35 = vmul.f32 %v384_v18, %v787_v54  ;;  %v360_v20 = vmul.f32 %v384_v18, %v773_v39  ;;  %v333_v19 = vmul.f32 %v328_v11, %v787_v54  ;;  %v492_v11 = vld [vmem:[%s882_s7] sm:$0xff] }
 0x349   :  { %402 = vrot.lane.b32.xlu0 %v398_v16, %s655_s11  ;;  %363 = vrot.lane.b32.xlu1 %v359_v0, %s659_s15 }
 0x34a   :  { %350 = vrot.lane.b32.xlu2 %v346_v28, %s657_s13 }
 0x351   :  { %376 = vrot.lane.b32.xlu0 %v372_v22, %s656_s12  ;;  %391 = vrot.lane.b32.xlu1 %v386_v23, %s658_s14 }
 0x352   :  { %430 = vrot.lane.b32.xlu2 %v425_v24, %s654_s10 }
 0x359   :  { %417 = vrot.lane.b32.xlu0 %v412_v25, %s653_s1  ;;  %352 = vrot.lane.b32.xlu1 %v347_v26, %s657_s13 }
 0x35a   :  { %378 = vrot.lane.b32.xlu2 %v373_v27, %s656_s12 }
 0x361   :  { %404 = vrot.lane.b32.xlu0 %v399_v21, %s655_s11 }
 0x362   :  { %339 = vrot.lane.b32.xlu2 %v334_v35, %s660_s2 }
 0x369   :  { %365 = vrot.lane.b32.xlu0 %v360_v20, %s659_s15 }
 0x371   :  { %337 = vrot.lane.b32.xlu0 %v333_v19, %s660_s2 }
 0x39c   :  { %v390_v33 = vpop.permute.xlu2 %389 }
 0x3a4   :  { %v351_v29 = vpop.permute.xlu2 %350 }
 0x3ac   :  { %v431_v30 = vpop.permute.xlu2 %430 }
 0x3b3   :  { %v429_v31 = vpop.permute.xlu0 %428  ;;  %v416_v32 = vpop.permute.xlu1 %415 }
 0x3b4   :  { %v432_v17 = vsel %vm233_vm5, %v429_v31, %v431_v30  ;;  %v379_v37 = vpop.permute.xlu2 %378 }
 0x3b5   :  { %456 = vmatpush.msra.mxu1 %v432_v17 }
 0x3bb   :  { %v403_v34 = vpop.permute.xlu0 %402  ;;  %v364_v36 = vpop.permute.xlu1 %363 }
 0x3bc   :  { %v340_v50 = vpop.permute.xlu2 %339 }
 0x3c3   :  { %v377_v38 = vpop.permute.xlu0 %376  ;;  %v392_v40 = vpop.permute.xlu1 %391 }
 0x3c4   :  { %v380_v39 = vsel %vm157_vm6, %v377_v38, %v379_v37  ;;  %v393_v41 = vsel %vm176_vm10, %v390_v33, %v392_v40 }
 0x3c5   :  { %382 = vst [vmem:[#allocation3 + $0x20] sm:$0xff] %v380_v39 }
 0x3cb   :  { %v418_v54 = vpop.permute.xlu0 %417  ;;  %v353_v42 = vpop.permute.xlu1 %352 }
 0x3cc   :  { %v419_v43 = vsel %vm214_vm3, %v416_v32, %v418_v54  ;;  %v354_v44 = vsel %vm119_vm4, %v351_v29, %v353_v42  ;;  %vm445_vm3 = vcmask 588800  }
 0x3cd   :  { %457 = vmatpush.msra.mxu1 %v419_v43  ;;  %356 = vst [vmem:[#allocation3 + $0x10] sm:$0xff] %v354_v44 }
 0x3d3   :  { %v405_v45 = vpop.permute.xlu0 %404 }
 0x3d4   :  { %v406_v47 = vsel %vm195_vm7, %v403_v34, %v405_v45 }
 0x3d5   :  { %458 = vmatpush.msra.mxu1 %v406_v47 }
 0x3d7   :  { %459 = vmatpush.msra.mxu1 %v393_v41 }
 0x3d9   :  { %460 = vmatpush.msra.mxu1 %v380_v39 }
 0x3db   :  { %v366_v48 = vpop.permute.xlu0 %365 }
 0x3dc   :  { %v367_v49 = vsel %vm138_vm9, %v364_v36, %v366_v48 }
 0x3dd   :  { %369 = vst [vmem:[#allocation3 + $0x18] sm:$0xff] %v367_v49  ;;  %461 = vmatpush.msra.mxu1 %v367_v49 }
 0x3df   :  { %462 = vmatpush.msra.mxu1 %v354_v44 }
 0x3e3   :  { %v338_v51 = vpop.permute.xlu0 %337 }
 0x3e4   :  { %v341_v52 = vsel %vm100_vm11, %v338_v51, %v340_v50 }
 0x3e5   :  { %343 = vst [vmem:[#allocation3 + $0x8] sm:$0xff] %v341_v52  ;;  %463 = vmatpush.msra.mxu1 %v341_v52 }
 0x3e7   :  { %464 = vmatpush.msra.mxu1 %v820_v12 }
 0x3e8   :  { %532 = vmatmul.msk.f32.vlgmr.msra.gmra.mxu1 %vm445_vm3, %v444_v53 }
 0x465   :  { %v466_v55 = vpop.f32.mrf.mxu1 }
 0x466   :  { %469 = vadd.xlane.f32.xlu1 %v466_v55  ;;  %v471_v56 = vmul.f32 %v466_v55, %v466_v55 }
 0x468   :  { %472 = vadd.xlane.f32.xlu0 %v471_v56 }
 0x4d9   :  { %v470_v57 = vpop.xlane.xlu1 %469 }
 0x4da   :  { %v474_v58 = vmul.f32 %v470_v57, %v805_v46 }
 0x4db   :  { %v473_v59 = vpop.xlane.xlu0 %472 }
 0x4dc   :  { %v476_v60 = vmul.f32 %v474_v58, %v474_v58  ;;  %v475_v61 = vmul.f32 %v473_v59, %v805_v46 }
 0x4de   :  { %v477_v62 = vsub.f32 %v475_v61, %v476_v60 }
 0x4e0   :  { %v478_v63 = vmax.f32 %v477_v62, 0.0 }
 0x4e2   :  { %v480_v1 = vadd.f32 1e-05, %v478_v63 }
 0x4e4   :  { %562 = vrsqrt.f32 %v480_v1  ;;  %vm487_vm5 = vweird.f32 %v480_v1 }
 0x4ea   :  { %v563_v2 = vpop.eup %562 }
 0x4eb   :  { %v482_v3 = vmul.f32 %v563_v2, %v480_v1  ;;  %vm488_vm4 = vweird.f32 %v563_v2 }
 0x4ec   :  { %vm489_vm6 = vmor %vm487_vm5, %vm488_vm4 }
 0x4ed   :  { %v483_v4 = vmul.f32 %v563_v2, %v482_v3 }
 0x4ef   :  { %v484_v5 = vmul.f32 0.5, %v483_v4 }
 0x4f1   :  { %v485_v6 = vsub.f32 1.5, %v484_v5 }
 0x4f3   :  { %v486_v8 = vmul.f32 %v563_v2, %v485_v6 }
 0x4f5   :  { %v490_v9 = vsel %vm489_vm6, %v563_v2, %v486_v8 }
 0x4f6   :  { %v491_v10 = vmul.f32 %v490_v9, %v479_v7 }
 0x4f8   :  { %497 = vperm.xlu2 %556, %v491_v10   ;;  %v493_v46 = vmul.f32 %v491_v10, %v474_v58 }
 0x4fa   :  { %v494_v12 = vsub.f32 %v492_v11, %v493_v46 }
 0x500   :  { %503 = vperm.xlu2 %556, %v494_v12  }
 0x552   :  { %v498_v13 = vpop.permute.xlu2 %497 }
 0x553   :  { %v500_v14 = vmul.f32 %v498_v13, %v466_v55 }
 0x55a   :  { %v504_v15 = vpop.permute.xlu2 %503 }
 0x55b   :  { %v506_v16 = vadd.f32 %v504_v15, %v500_v14 }
 0x55d   :  { %v507_v0 = vmax.f32 %v506_v16, 0.0 }
 0x55f   :  { %508 = vst [vmem:[#allocation9] sm:$0xff] %v507_v0 }
 0x560   :  { %519 = dma.vmem_to_hbm [thread:$0]  %s515_s22, 128, %s517_s6, [#allocation6]  }
 0x561   :  { %640 = dma.done.wait [#allocation6], 128  }
 0x562   :  { %641 = vsyncadd [#allocation6], 4294967168 }
 0x563   :  { %524 = vsyncpa [#allocation5], 1 }
 0x564   :  { %525 = vsyncpa [#allocation8], 1 }
 0x565   :  { %526 = vsyncpa [#allocation6], 1 }

</bundles_post_ra>
